<compile_context>
chip_gen: v6e
topology: v6e:2x2x1
jax: 0.10.0
libtpu: 0.0.40
codegen_flags: <defaults>
</compile_context>

<pallas_src>
import functools

import jax
import jax.numpy as jnp
from jax import lax
from jax.experimental import pallas as pl
from jax.experimental.pallas import tpu as pltpu

_LANE = 128


def _round_up(n, m):
    return ((n + m - 1) // m) * m


def _mlp_kernel(x_ref, y_ref, w1_ref, b1_ref, w2_ref, b2_ref, o_ref):
    """One batch tile of: ReLU((x + y) @ W1_t + b1) @ W2_t + b2.

    Shapes (per tile):
      x, y : [TM, indim]        f32
      W1_t : [indim, hid_p]     bf16 (pre-transposed, hidden dim padded to 128)
      b1   : [1, hid_p]         f32
      W2_t : [hid_p, outdim]    bf16 (pre-transposed)
      b2   : [1, outdim]        f32
      o    : [TM, outdim]       f32 (true-width store; no padded writeback)
    """
    z = (x_ref[...] + y_ref[...]).astype(jnp.bfloat16)
    # [M,K] x [K,N] canonical contraction -> MXU, f32 accumulation.
    h = jnp.dot(z, w1_ref[...], preferred_element_type=jnp.float32)
    h = jnp.maximum(h + b1_ref[...], 0.0)
    out = jnp.dot(h.astype(jnp.bfloat16), w2_ref[...],
                  preferred_element_type=jnp.float32)
    o_ref[...] = (out + b2_ref[...]).astype(o_ref.dtype)


def prepare_params(w1, b1, w2, b2):
    """One-time packing (call once, outside the hot path).

    Transposes PyTorch [out, in] weights to [K, N], zero-pads the hidden dim to
    128 lanes (padded hidden units compute ReLU(0)=0 and contribute 0 to the
    second matmul), casts weights to bf16 and biases to (1, N) f32 rows.
    """
    hiddim, indim = w1.shape
    outdim, _ = w2.shape
    hid_p = _round_up(hiddim, _LANE)

    w1_t = jnp.zeros((indim, hid_p), jnp.bfloat16).at[:, :hiddim].set(
        w1.T.astype(jnp.bfloat16))
    b1_p = jnp.zeros((1, hid_p), jnp.float32).at[0, :hiddim].set(
        b1.astype(jnp.float32))
    w2_t = jnp.zeros((hid_p, outdim), jnp.bfloat16).at[:hiddim, :].set(
        w2.T.astype(jnp.bfloat16))
    b2_p = b2.astype(jnp.float32).reshape(1, outdim)
    return w1_t, b1_p, w2_t, b2_p


def _choose_tm(B, block_m):
    """Batch tile: multiple of 8, no bigger than needed, >=2 grid steps if possible."""
    tm = max(8, (block_m // 8) * 8)          # (8,128) rule on 2nd-to-last dim
    tm = min(tm, _round_up(B, 8))            # don't exceed (padded) batch
    if B > 8 and pl.cdiv(B, tm) < 2:         # keep >=2 steps for v7x megacore
        tm = max(8, _round_up(pl.cdiv(B, 2), 8))
    return tm


@functools.partial(jax.jit, static_argnames=("block_m",))
def _forward_impl(x, y, w1_t, b1_p, w2_t, b2_p, *, block_m):
    B, indim = x.shape
    hid_p = w1_t.shape[1]
    outdim = w2_t.shape[1]

    tm = _choose_tm(B, block_m)
    grid = (pl.cdiv(B, tm),)  # ragged last block; OOB output rows are masked

    return pl.pallas_call(
        _mlp_kernel,
        out_shape=jax.ShapeDtypeStruct((B, outdim), x.dtype),
        grid=grid,
        in_specs=[
            pl.BlockSpec((tm, indim), lambda i: (i, 0)),      # x tile (pipelined)
            pl.BlockSpec((tm, indim), lambda i: (i, 0)),      # y tile (pipelined)
            pl.BlockSpec((indim, hid_p), lambda i: (0, 0)),   # W1_t resident
            pl.BlockSpec((1, hid_p), lambda i: (0, 0)),       # b1 resident
            pl.BlockSpec((hid_p, outdim), lambda i: (0, 0)),  # W2_t resident
            pl.BlockSpec((1, outdim), lambda i: (0, 0)),      # b2 resident
        ],
        out_specs=pl.BlockSpec((tm, outdim), lambda i: (i, 0)),
        compiler_params=pltpu.CompilerParams(
            dimension_semantics=("parallel",),
            vmem_limit_bytes=32 * 1024 * 1024,
        ),
    )(x, y, w1_t, b1_p, w2_t, b2_p)


def submod_forward_prepared(x, y, params, *, block_m=512):
    """Hot path: uses pre-packed params from `prepare_params`."""
    w1_t, b1_p, w2_t, b2_p = params
    return _forward_impl(x, y, w1_t, b1_p, w2_t, b2_p, block_m=block_m)


def submod_forward(x, y, w1, b1, w2, b2, *, block_m=512):
    """Convenience wrapper matching Submod.forward(x, y) with PyTorch params."""
    params = prepare_params(w1, b1, w2, b2)
    return submod_forward_prepared(x, y, params, block_m=block_m)


if __name__ == "__main__":
    # Shapes implied by the module: x, y: [batch, indim]; output: [batch, outdim]
    batch, indim, hiddim, outdim = 8, 32, 64, 16

    key = jax.random.PRNGKey(0)
    kx, ky, kw1, kb1, kw2, kb2, kx2, ky2 = jax.random.split(key, 8)

    x = jax.random.normal(kx, (batch, indim), dtype=jnp.float32)
    y = jax.random.normal(ky, (batch, indim), dtype=jnp.float32)

    # Deterministic params (uniform, like torch.nn.Linear's bound = 1/sqrt(fan_in))
    bound1 = 1.0 / (indim ** 0.5)
    bound2 = 1.0 / (hiddim ** 0.5)
    w1 = jax.random.uniform(kw1, (hiddim, indim), jnp.float32, -bound1, bound1)
    b1 = jax.random.uniform(kb1, (hiddim,), jnp.float32, -bound1, bound1)
    w2 = jax.random.uniform(kw2, (outdim, hiddim), jnp.float32, -bound2, bound2)
    b2 = jax.random.uniform(kb2, (outdim,), jnp.float32, -bound2, bound2)

    params = prepare_params(w1, b1, w2, b2)  # once, outside the hot path

    out = jax.block_until_ready(submod_forward_prepared(x, y, params))
    assert out.shape == (batch, outdim)

    # Reference with matching bf16-operand / f32-accumulate numerics.
    def ref_bf16(xx, yy):
        z = (xx + yy).astype(jnp.bfloat16)
        h = jnp.dot(z, w1.T.astype(jnp.bfloat16),
                    preferred_element_type=jnp.float32)
        h = jnp.maximum(h + b1, 0.0)
        o = jnp.dot(h.astype(jnp.bfloat16), w2.T.astype(jnp.bfloat16),
                    preferred_element_type=jnp.float32)
        return o + b2

    ref_f32 = jnp.maximum((x + y) @ w1.T + b1, 0.0) @ w2.T + b2
    assert jnp.allclose(out, ref_bf16(x, y), atol=1e-3, rtol=1e-3)
    assert jnp.allclose(out, ref_f32, atol=1e-1, rtol=1e-1)  # bf16-operand sanity

    # Second check: batch not a multiple of the tile -> ragged last grid block.
    batch2 = 200
    x2 = jax.random.normal(kx2, (batch2, indim), dtype=jnp.float32)
    y2 = jax.random.normal(ky2, (batch2, indim), dtype=jnp.float32)
    out2 = jax.block_until_ready(
        submod_forward_prepared(x2, y2, params, block_m=64))
    assert out2.shape == (batch2, outdim)
    assert jnp.allclose(out2, ref_bf16(x2, y2), atol=1e-3, rtol=1e-3)

    print("KERNEL_OK")
</pallas_src>

<mosaic_0001>
module attributes {stable_mosaic.version = 11 : i64} {
  func.func @_mlp_kernel(%arg0: i32, %arg1: memref<8x32xf32, #tpu.memory_space<vmem>>, %arg2: memref<8x32xf32, #tpu.memory_space<vmem>>, %arg3: memref<32x128xbf16, #tpu.memory_space<vmem>>, %arg4: memref<1x128xf32, #tpu.memory_space<vmem>>, %arg5: memref<128x16xbf16, #tpu.memory_space<vmem>>, %arg6: memref<1x16xf32, #tpu.memory_space<vmem>>, %arg7: memref<8x16xf32, #tpu.memory_space<vmem>>) attributes {dimension_semantics = [#tpu.dimension_semantics<parallel>], iteration_bounds = array<i64: 1>, scalar_prefetch = 0 : i64, scratch_operands = 0 : i64, tpu.core_type = #tpu.core_type<tc>, window_params = [{transform_indices = @transform_0, window_bounds = array<i64: 8, 32>}, {transform_indices = @transform_1, window_bounds = array<i64: 8, 32>}, {pipeline_mode = #tpu.pipeline_mode<synchronous>, transform_indices = @transform_2, window_bounds = array<i64: 32, 128>}, {pipeline_mode = #tpu.pipeline_mode<synchronous>, transform_indices = @transform_3, window_bounds = array<i64: 1, 128>}, {pipeline_mode = #tpu.pipeline_mode<synchronous>, transform_indices = @transform_4, window_bounds = array<i64: 128, 16>}, {pipeline_mode = #tpu.pipeline_mode<synchronous>, transform_indices = @transform_5, window_bounds = array<i64: 1, 16>}, {transform_indices = @transform_6, window_bounds = array<i64: 8, 16>}]} {
    %c0 = arith.constant 0 : index
    %c0_0 = arith.constant 0 : index
    %0 = vector.load %arg1[%c0, %c0_0] : memref<8x32xf32, #tpu.memory_space<vmem>>, vector<8x32xf32>
    %c0_1 = arith.constant 0 : index
    %c0_2 = arith.constant 0 : index
    %1 = vector.load %arg2[%c0_1, %c0_2] : memref<8x32xf32, #tpu.memory_space<vmem>>, vector<8x32xf32>
    %2 = arith.addf %0, %1 : vector<8x32xf32>
    %3 = arith.truncf %2 : vector<8x32xf32> to vector<8x32xbf16>
    %c0_3 = arith.constant 0 : index
    %c0_4 = arith.constant 0 : index
    %4 = vector.load %arg3[%c0_3, %c0_4] : memref<32x128xbf16, #tpu.memory_space<vmem>>, vector<32x128xbf16>
    %cst = arith.constant dense<0.000000e+00> : vector<8x128xf32>
    %5 = tpu.matmul %3, %4, %cst {dimension_numbers = #tpu.dot_dimension_numbers<[1], [0], [0], [1], [0, 0, 1, 1], [], []>} : vector<8x32xbf16>, vector<32x128xbf16>, vector<8x128xf32> -> vector<8x128xf32>
    %c0_5 = arith.constant 0 : index
    %c0_6 = arith.constant 0 : index
    %6 = vector.load %arg4[%c0_5, %c0_6] : memref<1x128xf32, #tpu.memory_space<vmem>>, vector<1x128xf32>
    %7 = vector.broadcast %6 : vector<1x128xf32> to vector<8x128xf32>
    %8 = arith.addf %5, %7 : vector<8x128xf32>
    %cst_7 = arith.constant 0.000000e+00 : f32
    %9 = vector.broadcast %cst_7 : f32 to vector<8x128xf32>
    %10 = arith.maximumf %8, %9 : vector<8x128xf32>
    %11 = arith.truncf %10 : vector<8x128xf32> to vector<8x128xbf16>
    %c0_8 = arith.constant 0 : index
    %c0_9 = arith.constant 0 : index
    %12 = vector.load %arg5[%c0_8, %c0_9] : memref<128x16xbf16, #tpu.memory_space<vmem>>, vector<128x16xbf16>
    %cst_10 = arith.constant dense<0.000000e+00> : vector<8x16xf32>
    %13 = tpu.matmul %11, %12, %cst_10 {dimension_numbers = #tpu.dot_dimension_numbers<[1], [0], [0], [1], [0, 0, 1, 1], [], []>} : vector<8x128xbf16>, vector<128x16xbf16>, vector<8x16xf32> -> vector<8x16xf32>
    %c0_11 = arith.constant 0 : index
    %c0_12 = arith.constant 0 : index
    %14 = vector.load %arg6[%c0_11, %c0_12] : memref<1x16xf32, #tpu.memory_space<vmem>>, vector<1x16xf32>
    %15 = vector.broadcast %14 : vector<1x16xf32> to vector<8x16xf32>
    %16 = arith.addf %13, %15 : vector<8x16xf32>
    %c0_13 = arith.constant 0 : index
    %c0_14 = arith.constant 0 : index
    %17 = vector.load %arg7[%c0_13, %c0_14] : memref<8x16xf32, #tpu.memory_space<vmem>>, vector<8x16xf32>
    tpu.vector_store %arg7[%c0_13, %c0_14], %16 {strides = array<i32>} : memref<8x16xf32, #tpu.memory_space<vmem>>, vector<8x16xf32>,
    return
  }
  func.func @transform_0(%arg0: i32) -> (i32, i32) {
    %c0_i32 = arith.constant 0 : i32
    %c0_i32_0 = arith.constant 0 : i32
    return %arg0, %c0_i32 : i32, i32
  }
  func.func @transform_1(%arg0: i32) -> (i32, i32) {
    %c0_i32 = arith.constant 0 : i32
    %c0_i32_0 = arith.constant 0 : i32
    return %arg0, %c0_i32 : i32, i32
  }
  func.func @transform_2(%arg0: i32) -> (i32, i32) {
    %c0_i32 = arith.constant 0 : i32
    %c0_i32_0 = arith.constant 0 : i32
    %c0_i32_1 = arith.constant 0 : i32
    return %c0_i32, %c0_i32_0 : i32, i32
  }
  func.func @transform_3(%arg0: i32) -> (i32, i32) {
    %c0_i32 = arith.constant 0 : i32
    %c0_i32_0 = arith.constant 0 : i32
    %c0_i32_1 = arith.constant 0 : i32
    return %c0_i32, %c0_i32_0 : i32, i32
  }
  func.func @transform_4(%arg0: i32) -> (i32, i32) {
    %c0_i32 = arith.constant 0 : i32
    %c0_i32_0 = arith.constant 0 : i32
    %c0_i32_1 = arith.constant 0 : i32
    return %c0_i32, %c0_i32_0 : i32, i32
  }
  func.func @transform_5(%arg0: i32) -> (i32, i32) {
    %c0_i32 = arith.constant 0 : i32
    %c0_i32_0 = arith.constant 0 : i32
    %c0_i32_1 = arith.constant 0 : i32
    return %c0_i32, %c0_i32_0 : i32, i32
  }
  func.func @transform_6(%arg0: i32) -> (i32, i32) {
    %c0_i32 = arith.constant 0 : i32
    %c0_i32_0 = arith.constant 0 : i32
    return %arg0, %c0_i32 : i32, i32
  }
}

</mosaic_0001>

<bundles_post_ra>
// kernel: _forward_impl.1
= control target key start
LH: loop header
LB: loop body
LE: loop exit
PB: predicated region body
PF: predicated region fallthrough
CT: control target
= control target key end

     0   :  { %v313_v1 = vmov 0.0   ;;  %vm314_vm0 = vmmov 0   ;;  %vm52_vm1 = vcmask 261120   ;;  %s396_s0 = inlined_call_operand.vmem [shape: f32[8,32], index: 0, kind: input, shape index: {}]   ;;  %s397_s1 = inlined_call_operand.vmem [shape: f32[8,32], index: 1, kind: input, shape index: {}]   ;;  %s398_s2 = inlined_call_operand.vmem [shape: bf16[32,128], index: 2, kind: input, shape index: {}]   ;;  %s399_s3 = inlined_call_operand.vmem [shape: f32[1,128], index: 3, kind: input, shape index: {}]   ;;  %s400_s4 = inlined_call_operand.vmem [shape: bf16[128,16], index: 4, kind: input, shape index: {}]   ;;  %s401_s5 = inlined_call_operand.vmem [shape: f32[1,16], index: 5, kind: input, shape index: {}]   ;;  %s402_s6 = inlined_call_operand.hbm [shape: f32[8,16], index: 6, kind: output, shape index: {}]  }
   0x1   :  { %v281_v0 = vld [vmem:[%s398_s2 + $0x8] sm:$0xff]   ;;  %250 = vmatprep.subr.bf16.mxu0 %v313_v1  ;;  %v282_v2 = vld [vmem:[%s398_s2] sm:$0xff]   ;;  %258 = vmatprep.subr.bf16.mxu1 %v313_v1  ;;  %v283_v6 = vld [vmem:[%s400_s4 + $0x38] sm:$0xff]  }
   0x2   :  { %251 = vmatpush3.bf16.msra.mxu0 %v281_v0  ;;  %254 = vmatprep.mubr.msk.bf16.mxu0 %vm314_vm0, %v313_v1  ;;  %v25_v3 = vld [vmem:[%s396_s0] sm:$0xff]  ;;  %v284_v8 = vld [vmem:[%s400_s4 + $0x30] sm:$0xff]   ;;  %v285_v9 = vld [vmem:[%s400_s4 + $0x28] sm:$0xff]  }
   0x3   :  { %v26_v4 = vld [vmem:[%s397_s1] sm:$0xff]  ;;  %252 = vmatprep.subr.bf16.mxu0 %v313_v1  ;;  %274 = vmatprep.mubr.msk.bf16.mxu1 %vm314_vm0, %v313_v1 }
   0x4   :  { %v27_v5 = vadd.f32 %v26_v4, %v25_v3  ;;  %259 = vmatpush3.bf16.msra.mxu1 %v283_v6 }
   0x5   :  { %260 = vmatprep.subr.bf16.mxu1 %v313_v1 }
   0x6   :  { %v28_v7 = vpack.c.bf16 %v27_v5, %v27_v5  ;;  %253 = vmatpush3.bf16.msra.mxu0 %v282_v2 }
   0x8   :  { %261 = vmatpush3.bf16.msra.mxu1 %v284_v8 }
   0x9   :  { %255 = vmatmul.mubr.msk.bf16.vlgmr.msra.gmra.mxu0 %vm52_vm1, %v28_v7  ;;  %262 = vmatprep.subr.bf16.mxu1 %v313_v1 }
   0xa   :  { %11 = vsyncpa [#allocation3], 0  ;;  %v286_v10 = vld [vmem:[%s400_s4 + $0x20] sm:$0xff]   ;;  %v287_v11 = vld [vmem:[%s400_s4 + $0x18] sm:$0xff]   ;;  %s315_s22 = smov [#allocation2]   ;;  %vm209_vm2 = vcmask 130048  }
   0xb   :  { %v288_v12 = vld [vmem:[%s400_s4 + $0x10] sm:$0xff]   ;;  %v289_v13 = vld [vmem:[%s400_s4 + $0x8] sm:$0xff]   ;;  %v290_v14 = vld [vmem:[%s400_s4] sm:$0xff]   ;;  %s217_s23 = sshll.u32 %s315_s22, 4  ;;  %s218_s23 = int_to_ptr.vmem [resolvable:$true] %s217_s23 }
   0xc   :  { %263 = vmatpush3.bf16.msra.mxu1 %v285_v9  ;;  %v225_v15 = vld [vmem:[%s399_s3] ss:$0 sm:$0xff]  ;;  %s291_s3 = scalar_lea.vmem %s218_s23, 128  ;;  %p296_p1 = scmp.lt.s32.totalorder %s218_s23, %s218_s23 }
   0xd   :  { %264 = vmatprep.subr.bf16.mxu1 %v313_v1  ;;  %v229_v23 = vld [vmem:[%s401_s5] ss:$0 sm:$0xff]  ;;  %p292_p0 = scmp.ne.s32.totalorder %s218_s23, %s291_s3  ;;  %p297_p2 = scmp.lt.s32.totalorder %s291_s3, %s291_s3 }
   0xf   :  { %p298_p3 = por %p297_p2, %p296_p1 }
  0x10   :  { %265 = vmatpush3.bf16.msra.mxu1 %v286_v10 }
  0x11   :  { %266 = vmatprep.subr.bf16.mxu1 %v313_v1  ;;  %p299_p4 = pnand %p298_p3, %p292_p0 }
  0x14   :  { %267 = vmatpush3.bf16.msra.mxu1 %v287_v11 }
  0x15   :  { %268 = vmatprep.subr.bf16.mxu1 %v313_v1 }
  0x18   :  { %269 = vmatpush3.bf16.msra.mxu1 %v288_v12 }
  0x19   :  { %270 = vmatprep.subr.bf16.mxu1 %v313_v1 }
  0x1c   :  { %271 = vmatpush3.bf16.msra.mxu1 %v289_v13 }
  0x1d   :  { %272 = vmatprep.subr.bf16.mxu1 %v313_v1 }
  0x20   :  { %273 = vmatpush3.bf16.msra.mxu1 %v290_v14 }
  0xc9   :  { %v90_v16 = vpop.f32.mrf.mxu0 }
  0xca   :  { %v91_v17 = vadd.f32 %v225_v15, %v90_v16 }
  0xcb   :  { %v256_v18 = vpop.f32.mrf.mxu0 }
  0xcc   :  { %v96_v19 = vmax.f32 %v91_v17, 0.0 }
  0xcd   :  { %v93_v20 = vpop.f32.mrf.mxu0 }
  0xce   :  { %v97_v21 = vpack.c.bf16 %v96_v19, %v96_v19 }
  0xcf   :  { %v257_v22 = vpop.f32.mrf.mxu0 }
  0xd0   :  { %275 = vmatmul.mubr.bf16.vlgmr.msra.gmra.mxu1 %v97_v21 }
 0x190   :  { %v203_v24 = vpop.f32.mrf.mxu1 }
 0x191   :  { %v204_v25 = vadd.f32 %v229_v23, %v203_v24 }
 0x192   :  { %v276_v26 = vpop.f32.mrf.mxu1 }
 0x193   :  { %210 = vst.msk [vmem:[#allocation2] sm:$0xff] %vm209_vm2, %v204_v25 }
 0x194   :  { %v206_v27 = vpop.f32.mrf.mxu1 }
 0x195   :  { %302 = shalt.err (!%p299_p4)
}
 0x196   :  { %220 = dma.vmem_to_hbm [thread:$0]  %s218_s23, 128, %s402_s6, [#allocation3]   ;;  %v277_v28 = vpop.f32.mrf.mxu1 }
 0x197   :  { %311 = dma.done.wait [#allocation3], 128  }
 0x198   :  { %312 = vsyncadd [#allocation3], 4294967168 }
 0x199   :  { %224 = vsyncpa [#allocation3], 1 }

</bundles_post_ra>
